<compile_context>
chip_gen: v7x
topology: tpu7x:2x2x1
jax: 0.10.0
libtpu: 0.0.40
codegen_flags: <defaults>
</compile_context>

<pallas_src>
import jax
import jax.numpy as jnp
from jax.experimental import pallas as pl
from jax.experimental.pallas import tpu as pltpu

_HIDDEN = (256, 64, 16)


def _round_up(x, m):
    return ((x + m - 1) // m) * m


def _silu_f32(h):
    # SiLU(x) = x * sigmoid(x) in f32; the logistic lands on the EUP slot.
    return h * jax.nn.sigmoid(h)


def scapenet_kernel(x_ref,
                    w1_ref, b1_ref,
                    w2_ref, b2_ref,
                    w3_ref, b3_ref,
                    w4_ref, b4_ref,
                    o_ref):
    """One batch tile through all 4 layers.

    Matmul operands are cast to the weight dtype (f32 or bf16); every jnp.dot
    accumulates in f32 (preferred_element_type), and the bias add + SiLU stay
    in f32 before casting back for the next MXU pass.
    """
    cdt = w1_ref.dtype
    h = x_ref[...].astype(cdt)

    a = jnp.dot(h, w1_ref[...], preferred_element_type=jnp.float32)
    h = _silu_f32(a + b1_ref[...].astype(jnp.float32)).astype(cdt)

    a = jnp.dot(h, w2_ref[...], preferred_element_type=jnp.float32)
    h = _silu_f32(a + b2_ref[...].astype(jnp.float32)).astype(cdt)

    a = jnp.dot(h, w3_ref[...], preferred_element_type=jnp.float32)
    h = _silu_f32(a + b3_ref[...].astype(jnp.float32)).astype(cdt)

    out = jnp.dot(h, w4_ref[...], preferred_element_type=jnp.float32)
    o_ref[...] = (out + b4_ref[...].astype(jnp.float32)).astype(o_ref.dtype)


def scapenet_forward(x, params, *, tile_m=1024, core_parallel=False):
    """x: (B, in_dim). params: w1..w4 as (in, out), b1..b4 as (1, out).

    Weight dtype selects the matmul operand dtype (float32 or bfloat16);
    accumulation is always float32 and the returned array is float32 with the
    exact shape (B, out_dim) -- no wrapper-side padding, cast or slicing.
    """
    B, in_dim = x.shape
    out_dim = params["w4"].shape[1]

    # ---- balanced batch tiling -------------------------------------------
    # Pick the number of tiles from tile_m, then spread rows evenly so the
    # ragged tail wastes at most one sublane row-group; Pallas pads the last
    # block itself (reads padded, OOB writes discarded), so no jnp.pad pass.
    B8 = _round_up(max(B, 1), 8)
    n_tiles = -(-B8 // tile_m)                 # ceil(B8 / tile_m)
    tile = _round_up(-(-B8 // n_tiles), 8)     # balanced tile, multiple of 8
    grid = (pl.cdiv(B, tile),)

    weights = (params["w1"], params["b1"],
               params["w2"], params["b2"],
               params["w3"], params["b3"],
               params["w4"], params["b4"])

    def resident(arr):
        # Constant index_map: same block every grid step -> Pallas keeps the
        # weight resident in VMEM instead of re-DMAing it per step.
        return pl.BlockSpec(arr.shape, lambda i: (0, 0))

    in_specs = [pl.BlockSpec((tile, in_dim), lambda i: (i, 0))]
    in_specs += [resident(a) for a in weights]
    # Output block last dim == full array dim (legal), so no 128-lane padding
    # and no extra HBM writeback of padded columns.
    out_specs = pl.BlockSpec((tile, out_dim), lambda i: (i, 0))

    # Advisory cost estimate so XLA schedules/overlaps the call correctly.
    dims = [(in_dim, _HIDDEN[0]), (_HIDDEN[0], _HIDDEN[1]),
            (_HIDDEN[1], _HIDDEN[2]), (_HIDDEN[2], out_dim)]
    flops = 2 * B * sum(fi * fo for fi, fo in dims)
    transcendentals = B * sum(_HIDDEN)
    bytes_accessed = (x.size * x.dtype.itemsize
                      + sum(a.size * a.dtype.itemsize for a in weights)
                      + B * out_dim * 4)

    # v7x: pass core_parallel=True so the batch tiles split across both
    # TensorCores (plain "parallel" is near-neutral on single-TC chips).
    semantics = (pltpu.CORE_PARALLEL,) if core_parallel else ("parallel",)

    return pl.pallas_call(
        scapenet_kernel,
        out_shape=jax.ShapeDtypeStruct((B, out_dim), jnp.float32),
        grid_spec=pltpu.PrefetchScalarGridSpec(
            num_scalar_prefetch=0,
            grid=grid,
            in_specs=in_specs,
            out_specs=out_specs,
        ),
        compiler_params=pltpu.CompilerParams(
            dimension_semantics=semantics,
        ),
        cost_estimate=pl.CostEstimate(
            flops=flops,
            transcendentals=transcendentals,
            bytes_accessed=bytes_accessed,
        ),
    )(x, *weights)


def init_params(key, in_dim, out_dim):
    """Deterministic synthetic init (PyTorch-like uniform bound 1/sqrt(fan_in))."""
    dims = [(in_dim, _HIDDEN[0]), (_HIDDEN[0], _HIDDEN[1]),
            (_HIDDEN[1], _HIDDEN[2]), (_HIDDEN[2], out_dim)]
    params = {}
    for idx, (fi, fo) in enumerate(dims, start=1):
        key, kw, kb = jax.random.split(key, 3)
        bound = 1.0 / (fi ** 0.5)
        # store weight as (in, out): equivalent to torch's (out, in) transposed
        params[f"w{idx}"] = jax.random.uniform(
            kw, (fi, fo), jnp.float32, minval=-bound, maxval=bound)
        params[f"b{idx}"] = jax.random.uniform(
            kb, (1, fo), jnp.float32, minval=-bound, maxval=bound)
    return params


def reference_forward(x, params):
    h = x @ params["w1"] + params["b1"]
    h = h * jax.nn.sigmoid(h)
    h = h @ params["w2"] + params["b2"]
    h = h * jax.nn.sigmoid(h)
    h = h @ params["w3"] + params["b3"]
    h = h * jax.nn.sigmoid(h)
    h = h @ params["w4"] + params["b4"]
    return h


if __name__ == "__main__":
    key = jax.random.PRNGKey(0)
    in_dim, out_dim = 32, 8
    batch = 16

    key, kx = jax.random.split(key)
    x = jax.random.normal(kx, (batch, in_dim), jnp.float32)
    params = init_params(key, in_dim, out_dim)

    ref = reference_forward(x, params)

    # f32 matmul operands: matches the f32 reference tightly on all chips.
    out = jax.block_until_ready(scapenet_forward(x, params))
    assert out.shape == (batch, out_dim)
    assert jnp.allclose(out, ref, atol=1e-4, rtol=1e-4), "f32 mismatch vs reference"

    # bf16 matmul operands (MXU fast path, recommended on v5e); accumulation
    # stays f32. Note: x and the biases are rounded to bf16 inside the kernel.
    params_bf16 = {k: v.astype(jnp.bfloat16) for k, v in params.items()}
    out_bf16 = jax.block_until_ready(scapenet_forward(x, params_bf16))
    assert out_bf16.shape == (batch, out_dim)
    assert bool(jnp.all(jnp.isfinite(out_bf16)))
    assert jnp.allclose(out_bf16, ref, atol=1e-1, rtol=1e-1), "bf16 mismatch vs reference"

    # Ragged batch (not a multiple of the tile / 8): exercised without any
    # wrapper-side padding or slicing -- the last block is handled by Pallas.
    key, kx2 = jax.random.split(key)
    x_ragged = jax.random.normal(kx2, (20, in_dim), jnp.float32)
    out_ragged = jax.block_until_ready(scapenet_forward(x_ragged, params))
    ref_ragged = reference_forward(x_ragged, params)
    assert out_ragged.shape == (20, out_dim)
    assert jnp.allclose(out_ragged, ref_ragged, atol=1e-4, rtol=1e-4), \
        "ragged-batch mismatch vs reference"

    print("KERNEL_OK")
</pallas_src>

<mosaic_0001>
module attributes {stable_mosaic.version = 11 : i64} {
  func.func @scapenet_kernel(%arg0: i32, %arg1: memref<16x32xf32, #tpu.memory_space<vmem>>, %arg2: memref<32x256xf32, #tpu.memory_space<vmem>>, %arg3: memref<1x256xf32, #tpu.memory_space<vmem>>, %arg4: memref<256x64xf32, #tpu.memory_space<vmem>>, %arg5: memref<1x64xf32, #tpu.memory_space<vmem>>, %arg6: memref<64x16xf32, #tpu.memory_space<vmem>>, %arg7: memref<1x16xf32, #tpu.memory_space<vmem>>, %arg8: memref<16x8xf32, #tpu.memory_space<vmem>>, %arg9: memref<1x8xf32, #tpu.memory_space<vmem>>, %arg10: memref<16x8xf32, #tpu.memory_space<vmem>>) attributes {dimension_semantics = [#tpu.dimension_semantics<parallel>], iteration_bounds = array<i64: 1>, scalar_prefetch = 0 : i64, scratch_operands = 0 : i64, tpu.core_type = #tpu.core_type<tc>, window_params = [{transform_indices = @transform_0, window_bounds = array<i64: 16, 32>}, {pipeline_mode = #tpu.pipeline_mode<synchronous>, transform_indices = @transform_1, window_bounds = array<i64: 32, 256>}, {pipeline_mode = #tpu.pipeline_mode<synchronous>, transform_indices = @transform_2, window_bounds = array<i64: 1, 256>}, {pipeline_mode = #tpu.pipeline_mode<synchronous>, transform_indices = @transform_3, window_bounds = array<i64: 256, 64>}, {pipeline_mode = #tpu.pipeline_mode<synchronous>, transform_indices = @transform_4, window_bounds = array<i64: 1, 64>}, {pipeline_mode = #tpu.pipeline_mode<synchronous>, transform_indices = @transform_5, window_bounds = array<i64: 64, 16>}, {pipeline_mode = #tpu.pipeline_mode<synchronous>, transform_indices = @transform_6, window_bounds = array<i64: 1, 16>}, {pipeline_mode = #tpu.pipeline_mode<synchronous>, transform_indices = @transform_7, window_bounds = array<i64: 16, 8>}, {pipeline_mode = #tpu.pipeline_mode<synchronous>, transform_indices = @transform_8, window_bounds = array<i64: 1, 8>}, {transform_indices = @transform_9, window_bounds = array<i64: 16, 8>}]} {
    %c0 = arith.constant 0 : index
    %c0_0 = arith.constant 0 : index
    %0 = vector.load %arg1[%c0, %c0_0] : memref<16x32xf32, #tpu.memory_space<vmem>>, vector<16x32xf32>
    %c0_1 = arith.constant 0 : index
    %c0_2 = arith.constant 0 : index
    %1 = vector.load %arg2[%c0_1, %c0_2] : memref<32x256xf32, #tpu.memory_space<vmem>>, vector<32x256xf32>
    %cst = arith.constant dense<0.000000e+00> : vector<16x256xf32>
    %2 = tpu.matmul %0, %1, %cst {dimension_numbers = #tpu.dot_dimension_numbers<[1], [0], [0], [1], [0, 0, 1, 1], [], []>} : vector<16x32xf32>, vector<32x256xf32>, vector<16x256xf32> -> vector<16x256xf32>
    %c0_3 = arith.constant 0 : index
    %c0_4 = arith.constant 0 : index
    %3 = vector.load %arg3[%c0_3, %c0_4] : memref<1x256xf32, #tpu.memory_space<vmem>>, vector<1x256xf32>
    %4 = vector.broadcast %3 : vector<1x256xf32> to vector<16x256xf32>
    %5 = arith.addf %2, %4 : vector<16x256xf32>
    %6 = arith.negf %5 : vector<16x256xf32>
    %7 = math.exp %6 : vector<16x256xf32>
    %cst_5 = arith.constant 1.000000e+00 : f32
    %8 = vector.broadcast %cst_5 : f32 to vector<16x256xf32>
    %9 = arith.addf %8, %7 : vector<16x256xf32>
    %10 = arith.divf %8, %9 : vector<16x256xf32>
    %11 = arith.mulf %5, %10 : vector<16x256xf32>
    %c0_6 = arith.constant 0 : index
    %c0_7 = arith.constant 0 : index
    %12 = vector.load %arg4[%c0_6, %c0_7] : memref<256x64xf32, #tpu.memory_space<vmem>>, vector<256x64xf32>
    %cst_8 = arith.constant dense<0.000000e+00> : vector<16x64xf32>
    %13 = tpu.matmul %11, %12, %cst_8 {dimension_numbers = #tpu.dot_dimension_numbers<[1], [0], [0], [1], [0, 0, 1, 1], [], []>} : vector<16x256xf32>, vector<256x64xf32>, vector<16x64xf32> -> vector<16x64xf32>
    %c0_9 = arith.constant 0 : index
    %c0_10 = arith.constant 0 : index
    %14 = vector.load %arg5[%c0_9, %c0_10] : memref<1x64xf32, #tpu.memory_space<vmem>>, vector<1x64xf32>
    %15 = vector.broadcast %14 : vector<1x64xf32> to vector<16x64xf32>
    %16 = arith.addf %13, %15 : vector<16x64xf32>
    %17 = arith.negf %16 : vector<16x64xf32>
    %18 = math.exp %17 : vector<16x64xf32>
    %cst_11 = arith.constant 1.000000e+00 : f32
    %19 = vector.broadcast %cst_11 : f32 to vector<16x64xf32>
    %20 = arith.addf %19, %18 : vector<16x64xf32>
    %21 = arith.divf %19, %20 : vector<16x64xf32>
    %22 = arith.mulf %16, %21 : vector<16x64xf32>
    %c0_12 = arith.constant 0 : index
    %c0_13 = arith.constant 0 : index
    %23 = vector.load %arg6[%c0_12, %c0_13] : memref<64x16xf32, #tpu.memory_space<vmem>>, vector<64x16xf32>
    %cst_14 = arith.constant dense<0.000000e+00> : vector<16x16xf32>
    %24 = tpu.matmul %22, %23, %cst_14 {dimension_numbers = #tpu.dot_dimension_numbers<[1], [0], [0], [1], [0, 0, 1, 1], [], []>} : vector<16x64xf32>, vector<64x16xf32>, vector<16x16xf32> -> vector<16x16xf32>
    %c0_15 = arith.constant 0 : index
    %c0_16 = arith.constant 0 : index
    %25 = vector.load %arg7[%c0_15, %c0_16] : memref<1x16xf32, #tpu.memory_space<vmem>>, vector<1x16xf32>
    %26 = vector.broadcast %25 : vector<1x16xf32> to vector<16x16xf32>
    %27 = arith.addf %24, %26 : vector<16x16xf32>
    %28 = arith.negf %27 : vector<16x16xf32>
    %29 = math.exp %28 : vector<16x16xf32>
    %cst_17 = arith.constant 1.000000e+00 : f32
    %30 = vector.broadcast %cst_17 : f32 to vector<16x16xf32>
    %31 = arith.addf %30, %29 : vector<16x16xf32>
    %32 = arith.divf %30, %31 : vector<16x16xf32>
    %33 = arith.mulf %27, %32 : vector<16x16xf32>
    %c0_18 = arith.constant 0 : index
    %c0_19 = arith.constant 0 : index
    %34 = vector.load %arg8[%c0_18, %c0_19] : memref<16x8xf32, #tpu.memory_space<vmem>>, vector<16x8xf32>
    %cst_20 = arith.constant dense<0.000000e+00> : vector<16x8xf32>
    %35 = tpu.matmul %33, %34, %cst_20 {dimension_numbers = #tpu.dot_dimension_numbers<[1], [0], [0], [1], [0, 0, 1, 1], [], []>} : vector<16x16xf32>, vector<16x8xf32>, vector<16x8xf32> -> vector<16x8xf32>
    %c0_21 = arith.constant 0 : index
    %c0_22 = arith.constant 0 : index
    %36 = vector.load %arg9[%c0_21, %c0_22] : memref<1x8xf32, #tpu.memory_space<vmem>>, vector<1x8xf32>
    %37 = vector.broadcast %36 : vector<1x8xf32> to vector<16x8xf32>
    %38 = arith.addf %35, %37 : vector<16x8xf32>
    %c0_23 = arith.constant 0 : index
    %c0_24 = arith.constant 0 : index
    %39 = vector.load %arg10[%c0_23, %c0_24] : memref<16x8xf32, #tpu.memory_space<vmem>>, vector<16x8xf32>
    tpu.vector_store %arg10[%c0_23, %c0_24], %38 {strides = array<i32>} : memref<16x8xf32, #tpu.memory_space<vmem>>, vector<16x8xf32>,
    return
  }
  func.func @transform_0(%arg0: i32) -> (i32, i32) {
    %c0_i32 = arith.constant 0 : i32
    %c0_i32_0 = arith.constant 0 : i32
    return %arg0, %c0_i32 : i32, i32
  }
  func.func @transform_1(%arg0: i32) -> (i32, i32) {
    %c0_i32 = arith.constant 0 : i32
    %c0_i32_0 = arith.constant 0 : i32
    %c0_i32_1 = arith.constant 0 : i32
    return %c0_i32, %c0_i32_0 : i32, i32
  }
  func.func @transform_2(%arg0: i32) -> (i32, i32) {
    %c0_i32 = arith.constant 0 : i32
    %c0_i32_0 = arith.constant 0 : i32
    %c0_i32_1 = arith.constant 0 : i32
    return %c0_i32, %c0_i32_0 : i32, i32
  }
  func.func @transform_3(%arg0: i32) -> (i32, i32) {
    %c0_i32 = arith.constant 0 : i32
    %c0_i32_0 = arith.constant 0 : i32
    %c0_i32_1 = arith.constant 0 : i32
    return %c0_i32, %c0_i32_0 : i32, i32
  }
  func.func @transform_4(%arg0: i32) -> (i32, i32) {
    %c0_i32 = arith.constant 0 : i32
    %c0_i32_0 = arith.constant 0 : i32
    %c0_i32_1 = arith.constant 0 : i32
    return %c0_i32, %c0_i32_0 : i32, i32
  }
  func.func @transform_5(%arg0: i32) -> (i32, i32) {
    %c0_i32 = arith.constant 0 : i32
    %c0_i32_0 = arith.constant 0 : i32
    %c0_i32_1 = arith.constant 0 : i32
    return %c0_i32, %c0_i32_0 : i32, i32
  }
  func.func @transform_6(%arg0: i32) -> (i32, i32) {
    %c0_i32 = arith.constant 0 : i32
    %c0_i32_0 = arith.constant 0 : i32
    %c0_i32_1 = arith.constant 0 : i32
    return %c0_i32, %c0_i32_0 : i32, i32
  }
  func.func @transform_7(%arg0: i32) -> (i32, i32) {
    %c0_i32 = arith.constant 0 : i32
    %c0_i32_0 = arith.constant 0 : i32
    %c0_i32_1 = arith.constant 0 : i32
    return %c0_i32, %c0_i32_0 : i32, i32
  }
  func.func @transform_8(%arg0: i32) -> (i32, i32) {
    %c0_i32 = arith.constant 0 : i32
    %c0_i32_0 = arith.constant 0 : i32
    %c0_i32_1 = arith.constant 0 : i32
    return %c0_i32, %c0_i32_0 : i32, i32
  }
  func.func @transform_9(%arg0: i32) -> (i32, i32) {
    %c0_i32 = arith.constant 0 : i32
    %c0_i32_0 = arith.constant 0 : i32
    return %arg0, %c0_i32 : i32, i32
  }
}

</mosaic_0001>

<bundles_post_ra>
// kernel: tpu_custom_call.1
= control target key start
LH: loop header
LB: loop body
LE: loop exit
PB: predicated region body
PF: predicated region fallthrough
CT: control target
= control target key end

     0   :  { %v691_v3 = vmov 0.0   ;;  %vm54_vm0 = vcmask 261120   ;;  %v44_v63 = vlaneseq  ;;  %vm309_vm1 = vcmask 523264   ;;  %s916_s1 = inlined_call_operand.vmem [shape: f32[32,256], index: 1, kind: input, shape index: {}]   ;;  %s917_s0 = inlined_call_operand.vmem [shape: f32[16,32], index: 0, kind: input, shape index: {}]   ;;  %s918_s3 = inlined_call_operand.vmem [shape: f32[256,64], index: 3, kind: input, shape index: {}]   ;;  %s919_s2 = inlined_call_operand.vmem [shape: f32[1,256], index: 2, kind: input, shape index: {}]   ;;  %s920_s5 = inlined_call_operand.vmem [shape: f32[64,16], index: 5, kind: input, shape index: {}]   ;;  %s921_s4 = inlined_call_operand.vmem [shape: f32[1,64], index: 4, kind: input, shape index: {}]   ;;  %s922_s7 = inlined_call_operand.vmem [shape: f32[16,8], index: 7, kind: input, shape index: {}]   ;;  %s923_s6 = inlined_call_operand.vmem [shape: f32[1,16], index: 6, kind: input, shape index: {}]   ;;  %s924_s8 = inlined_call_operand.vmem [shape: f32[1,8], index: 8, kind: input, shape index: {}]   ;;  %s925_s9 = inlined_call_operand.vmem [shape: f32[16,8], index: 9, kind: output, shape index: {}]  }
   0x1   :  { %v35_v0 = vld [vmem:[%s916_s1 + $0x8] sm:$0xff]  ;;  %v37_v1 = vld [vmem:[%s916_s1 + $0x18] sm:$0xff]  ;;  %v34_v2 = vld [vmem:[%s916_s1] sm:$0xff]  ;;  %125 = vmatprep.mubr.f32.mxu0 %v691_v3  ;;  %vm414_vm2 = vcmask 130048   ;;  %vm496_vm3 = vcmask 64512  }
   0x2   :  { %v598_v4 = vpack.c.bf16 %v37_v1, %v35_v0  ;;  %v36_v5 = vld [vmem:[%s916_s1 + $0x10] sm:$0xff]  ;;  %v39_v6 = vld [vmem:[%s916_s1 + $0x28] sm:$0xff]  ;;  %v41_v7 = vld [vmem:[%s916_s1 + $0x38] sm:$0xff]  ;;  %v45_v0 = vshrl.u32 %v44_v63, 7 }
   0x3   :  { %v600_v8 = vpack.c.bf16 %v36_v5, %v34_v2  ;;  %v602_v9 = vpack.c.bf16 %v41_v7, %v39_v6  ;;  %v38_v10 = vld [vmem:[%s916_s1 + $0x20] sm:$0xff]  ;;  %v40_v11 = vld [vmem:[%s916_s1 + $0x30] sm:$0xff]  ;;  %v33_v14 = vld [vmem:[%s917_s0 + $0x8] sm:$0xff] }
   0x4   :  { %599 = vmatprep.subr.bf16.mxu0 %v598_v4  ;;  %v604_v12 = vpack.c.bf16 %v40_v11, %v38_v10  ;;  %v32_v13 = vld [vmem:[%s917_s0] sm:$0xff]  ;;  %v183_v16 = vld [vmem:[%s918_s3 + $0x88] sm:$0xff]  ;;  %v184_v21 = vld [vmem:[%s918_s3 + $0x90] sm:$0xff]  ;;  %v46_v1 = vsub.s32 0, %v45_v0 }
   0x5   :  { %601 = vmatpush1.bf16.msra.mxu0 %v600_v8  ;;  %v182_v15 = vld [vmem:[%s918_s3 + $0x80] sm:$0xff]  ;;  %v167_v19 = vld [vmem:[%s918_s3 + $0x8] sm:$0xff]  ;;  %v185_v22 = vld [vmem:[%s918_s3 + $0x98] sm:$0xff] }
   0x6   :  { %603 = vmatprep.subr.bf16.mxu0 %v602_v9  ;;  %v606_v17 = vpack.c.bf16 %v183_v16, %v182_v15  ;;  %v166_v18 = vld [vmem:[%s918_s3] sm:$0xff]  ;;  %v610_v23 = vpack.c.bf16 %v185_v22, %v184_v21  ;;  %v168_v24 = vld [vmem:[%s918_s3 + $0x10] sm:$0xff]  ;;  %v169_v25 = vld [vmem:[%s918_s3 + $0x18] sm:$0xff] }
   0x7   :  { %v608_v20 = vpack.c.bf16 %v167_v19, %v166_v18  ;;  %v612_v26 = vpack.c.bf16 %v169_v25, %v168_v24  ;;  %v186_v27 = vld [vmem:[%s918_s3 + $0xa0] sm:$0xff]  ;;  %v187_v28 = vld [vmem:[%s918_s3 + $0xa8] sm:$0xff]  ;;  %v188_v33 = vld [vmem:[%s918_s3 + $0xb0] sm:$0xff] }
   0x8   :  { %607 = vmatprep.subr.bf16.mxu1 %v606_v17  ;;  %v614_v29 = vpack.c.bf16 %v187_v28, %v186_v27  ;;  %v170_v30 = vld [vmem:[%s918_s3 + $0x20] sm:$0xff]  ;;  %v171_v31 = vld [vmem:[%s918_s3 + $0x28] sm:$0xff]  ;;  %v189_v34 = vld [vmem:[%s918_s3 + $0xb8] sm:$0xff] }
   0x9   :  { %605 = vmatpush1.bf16.msra.mxu0 %v604_v12  ;;  %609 = vmatpush3.bf16.msra.mxu1 %v608_v20  ;;  %v616_v32 = vpack.c.bf16 %v171_v31, %v170_v30  ;;  %v618_v35 = vpack.c.bf16 %v189_v34, %v188_v33  ;;  %v172_v36 = vld [vmem:[%s918_s3 + $0x30] sm:$0xff]  ;;  %v173_v37 = vld [vmem:[%s918_s3 + $0x38] sm:$0xff]  ;;  %v190_v39 = vld [vmem:[%s918_s3 + $0xc0] sm:$0xff] }
   0xa   :  { %611 = vmatprep.subr.bf16.mxu1 %v610_v23  ;;  %v620_v38 = vpack.c.bf16 %v173_v37, %v172_v36  ;;  %v191_v40 = vld [vmem:[%s918_s3 + $0xc8] sm:$0xff]  ;;  %v174_v42 = vld [vmem:[%s918_s3 + $0x40] sm:$0xff]  ;;  %v192_v45 = vld [vmem:[%s918_s3 + $0xd0] sm:$0xff] }
   0xb   :  { %v622_v41 = vpack.c.bf16 %v191_v40, %v190_v39  ;;  %v175_v43 = vld [vmem:[%s918_s3 + $0x48] sm:$0xff]  ;;  %v193_v46 = vld [vmem:[%s918_s3 + $0xd8] sm:$0xff]  ;;  %v176_v48 = vld [vmem:[%s918_s3 + $0x50] sm:$0xff] }
   0xc   :  { %503 = vmatmul.mubr.msk.f32.vlgmr.msra.gmra.mrb[0].mxu0 %vm54_vm0, %v32_v13  ;;  %v624_v44 = vpack.c.bf16 %v175_v43, %v174_v42  ;;  %v626_v47 = vpack.c.bf16 %v193_v46, %v192_v45  ;;  %v177_v49 = vld [vmem:[%s918_s3 + $0x58] sm:$0xff]  ;;  %v194_v51 = vld [vmem:[%s918_s3 + $0xe0] sm:$0xff]  ;;  %v195_v52 = vld [vmem:[%s918_s3 + $0xe8] sm:$0xff] }
   0xd   :  { %131 = vmatprep.mubr.f32.mxu0 %v691_v3  ;;  %613 = vmatpush3.bf16.msra.mxu1 %v612_v26  ;;  %v628_v50 = vpack.c.bf16 %v177_v49, %v176_v48  ;;  %v630_v53 = vpack.c.bf16 %v195_v52, %v194_v51  ;;  %v178_v54 = vld [vmem:[%s918_s3 + $0x60] sm:$0xff]  ;;  %v179_v55 = vld [vmem:[%s918_s3 + $0x68] sm:$0xff]  ;;  %v196_v57 = vld [vmem:[%s918_s3 + $0xf0] sm:$0xff]  ;;  %v50_v3 = vsub.s32 1, %v45_v0 }
   0xe   :  { %615 = vmatprep.subr.bf16.mxu1 %v614_v29  ;;  %v632_v56 = vpack.c.bf16 %v179_v55, %v178_v54  ;;  %v197_v58 = vld [vmem:[%s918_s3 + $0xf8] sm:$0xff]  ;;  %v180_v60 = vld [vmem:[%s918_s3 + $0x70] sm:$0xff]  ;;  %v42_v2 = vld [vmem:[%s919_s2] sm:$0x3] }
   0xf   :  { %v634_v59 = vpack.c.bf16 %v197_v58, %v196_v57  ;;  %v181_v61 = vld [vmem:[%s918_s3 + $0x78] sm:$0xff]  ;;  %v47_v4 = vrot.slane %v42_v2, %v46_v1  ;;  %v51_v5 = vrot.slane %v42_v2, %v50_v3  ;;  %v294_v34 = vld [vmem:[%s920_s5] sm:$0xff]  ;;  %v296_v37 = vld [vmem:[%s920_s5 + $0x10] sm:$0xff] }
  0x10   :  { %504 = vmatmul.mubr.msk.f32.gmra.mrb[2].mxu0 %vm54_vm0, %v33_v14  ;;  %v636_v62 = vpack.c.bf16 %v181_v61, %v180_v60  ;;  %v298_v40 = vld [vmem:[%s920_s5 + $0x20] sm:$0xff]  ;;  %v300_v43 = vld [vmem:[%s920_s5 + $0x30] sm:$0xff]  ;;  %v406_v2 = vld [vmem:[%s922_s7 + $0x8] sm:$0xff] }
  0x11   :  { %617 = vmatpush3.bf16.msra.mxu1 %v616_v32  ;;  %v405_v1 = vld [vmem:[%s922_s7] sm:$0xff] }
  0x12   :  { %619 = vmatprep.subr.bf16.mxu1 %v618_v35  ;;  %v295_v35 = vld [vmem:[%s920_s5 + $0x8] sm:$0xff]  ;;  %v654_v3 = vpack.c.bf16 %v406_v2, %v405_v1 }
  0x13   :  { %v638_v36 = vpack.c.bf16 %v295_v35, %v294_v34 }
  0x15   :  { %621 = vmatpush3.bf16.msra.mxu1 %v620_v38  ;;  %639 = vmatprep.subr.bf16.mxu0 %v638_v36  ;;  %v297_v38 = vld [vmem:[%s920_s5 + $0x18] sm:$0xff] }
  0x16   :  { %623 = vmatprep.subr.bf16.mxu1 %v622_v41  ;;  %641 = vmatpush3.bf16.msra.mxu0 %v638_v36  ;;  %v642_v39 = vpack.c.bf16 %v297_v38, %v296_v37  ;;  %v299_v41 = vld [vmem:[%s920_s5 + $0x28] sm:$0xff] }
  0x17   :  { %v646_v42 = vpack.c.bf16 %v299_v41, %v298_v40 }
  0x18   :  { %643 = vmatprep.subr.bf16.mxu0 %v642_v39 }
  0x19   :  { %625 = vmatpush3.bf16.msra.mxu1 %v624_v44  ;;  %v301_v44 = vld [vmem:[%s920_s5 + $0x38] sm:$0xff] }
  0x1a   :  { %627 = vmatprep.subr.bf16.mxu1 %v626_v47  ;;  %645 = vmatpush3.bf16.msra.mxu0 %v642_v39  ;;  %v650_v45 = vpack.c.bf16 %v301_v44, %v300_v43  ;;  %v509_v47 = vld [vmem:[%s921_s4] ss:$0 sm:$0xff] }
  0x1b   :  { %647 = vmatprep.subr.bf16.mxu0 %v646_v42 }
  0x1d   :  { %629 = vmatpush3.bf16.msra.mxu1 %v628_v50 }
  0x1e   :  { %631 = vmatprep.subr.bf16.mxu1 %v630_v53  ;;  %649 = vmatpush3.bf16.msra.mxu0 %v646_v42 }
  0x1f   :  { %651 = vmatprep.subr.bf16.mxu0 %v650_v45 }
  0x21   :  { %633 = vmatpush3.bf16.msra.mxu1 %v632_v56 }
  0x22   :  { %635 = vmatprep.subr.bf16.mxu1 %v634_v59  ;;  %653 = vmatpush3.bf16.msra.mxu0 %v650_v45 }
  0x23   :  { %655 = vmatprep.subr.bf16.mxu0 %v654_v3 }
  0x25   :  { %637 = vmatpush3.bf16.msra.mxu1 %v636_v62 }
  0xdf   :  { %v127_v6 = vpop.f32.mrb[0].mxu0 }
  0xe0   :  { %v128_v7 = vadd.f32 %v127_v6, %v47_v4  ;;  %v129_v8 = vpop.f32.mrb[1].mxu0 }
  0xe1   :  { %v130_v9 = vadd.f32 %v129_v8, %v51_v5 }
  0xe2   :  { %v505_v10 = vmul.f32 -1.442695, %v128_v7 }
  0xe3   :  { %v506_v11 = vmul.f32 -1.442695, %v130_v9  ;;  %v133_v12 = vpop.f32.mrb[2].mxu0 }
  0xe4   :  { %659 = vpow2.f32 %v505_v10  ;;  %v134_v13 = vadd.f32 %v133_v12, %v47_v4  ;;  %v135_v14 = vpop.f32.mrb[3].mxu0  ;;  %v512_v4 = vld [vmem:[%s923_s6] ss:$0 sm:$0xff] }
  0xe5   :  { %661 = vpow2.f32 %v506_v11  ;;  %v136_v15 = vadd.f32 %v135_v14, %v51_v5 }
  0xe6   :  { %v507_v16 = vmul.f32 -1.442695, %v134_v13 }
  0xe7   :  { %v508_v17 = vmul.f32 -1.442695, %v136_v15 }
  0xe8   :  { %663 = vpow2.f32 %v507_v16 }
  0xe9   :  { %665 = vpow2.f32 %v508_v17 }
  0xee   :  { %v660_v18 = vpop.eup %659 }
  0xef   :  { %v662_v19 = vpop.eup %661  ;;  %v150_v20 = vadd.f32 1.0, %v660_v18 }
  0xf0   :  { %v151_v21 = vadd.f32 1.0, %v662_v19  ;;  %v517_v19 = vld [vmem:[%s924_s8] ss:$0 sm:$0xff] }
  0xf1   :  { %667 = vrcp.f32 %v150_v20 }
  0xf2   :  { %v664_v22 = vpop.eup %663  ;;  %669 = vrcp.f32 %v151_v21 }
  0xf3   :  { %v666_v23 = vpop.eup %665  ;;  %v152_v24 = vadd.f32 1.0, %v664_v22 }
  0xf4   :  { %v153_v25 = vadd.f32 1.0, %v666_v23 }
  0xf5   :  { %671 = vrcp.f32 %v152_v24 }
  0xf6   :  { %673 = vrcp.f32 %v153_v25 }
  0xfb   :  { %v668_v26 = vpop.eup %667 }
  0xfc   :  { %v670_v27 = vpop.eup %669  ;;  %v162_v29 = vmul.f32 %v668_v26, %v128_v7 }
  0xfd   :  { %v163_v28 = vmul.f32 %v670_v27, %v130_v9 }
  0xff   :  { %v672_v30 = vpop.eup %671  ;;  %269 = vmatprep.mubr.f32.mxu1 %v163_v28 }
 0x100   :  { %v674_v31 = vpop.eup %673  ;;  %270 = vmatmul.mubr.f32.vlgmr.msra.gmra.mrb[0].mxu1 %v162_v29  ;;  %v164_v33 = vmul.f32 %v672_v30, %v134_v13 }
 0x101   :  { %v165_v32 = vmul.f32 %v674_v31, %v136_v15 }
 0x103   :  { %274 = vmatprep.mubr.f32.mxu1 %v165_v32 }
 0x104   :  { %275 = vmatmul.mubr.f32.gmra.mrb[2].mxu1 %v164_v33 }
 0x1d3   :  { %v552_v46 = vpop.f32.mrb[0].mxu1 }
 0x1d4   :  { %v553_v48 = vpop.f32.mrb[1].mxu1 }
 0x1d5   :  { %v554_v49 = vadd.f32 %v553_v48, %v552_v46 }
 0x1d7   :  { %v272_v50 = vadd.f32 %v554_v49, %v509_v47  ;;  %v555_v51 = vpop.f32.mrb[2].mxu1 }
 0x1d8   :  { %v556_v52 = vpop.f32.mrb[3].mxu1 }
 0x1d9   :  { %v510_v53 = vmul.f32 -1.442695, %v272_v50  ;;  %v557_v54 = vadd.f32 %v556_v52, %v555_v51 }
 0x1db   :  { %675 = vpow2.f32 %v510_v53  ;;  %v277_v55 = vadd.f32 %v557_v54, %v509_v47 }
 0x1dd   :  { %v511_v56 = vmul.f32 -1.442695, %v277_v55 }
 0x1df   :  { %677 = vpow2.f32 %v511_v56 }
 0x1e5   :  { %v676_v57 = vpop.eup %675 }
 0x1e6   :  { %v286_v58 = vadd.f32 1.0, %v676_v57 }
 0x1e8   :  { %679 = vrcp.f32 %v286_v58 }
 0x1e9   :  { %v678_v59 = vpop.eup %677 }
 0x1ea   :  { %v287_v60 = vadd.f32 1.0, %v678_v59 }
 0x1ec   :  { %681 = vrcp.f32 %v287_v60 }
 0x1f2   :  { %v680_v61 = vpop.eup %679 }
 0x1f3   :  { %v292_v62 = vmul.f32 %v680_v61, %v272_v50 }
 0x1f5   :  { %588 = vmatprep.mubr.msk.f32.mxu0 %vm309_vm1, %v292_v62 }
 0x1f6   :  { %v682_v63 = vpop.eup %681 }
 0x1f7   :  { %v293_v0 = vmul.f32 %v682_v63, %v277_v55 }
 0x1f9   :  { %589 = vmatmul.mubr.msk.f32.vlgmr.msra.gmra.mrb[4].mxu0 %vm309_vm1, %v293_v0 }
 0x1fa   :  { %657 = vmatpush3.bf16.msra.mxu0 %v654_v3 }
 0x2cc   :  { %v590_v5 = vpop.f32.mrb[4].mxu0 }
 0x2cd   :  { %v388_v6 = vadd.f32 %v590_v5, %v512_v4  ;;  %v382_v7 = vpop.f32.mrb[5].mxu0 }
 0x2ce   :  { %v383_v8 = vadd.f32 %v512_v4, %v382_v7 }
 0x2cf   :  { %v516_v9 = vmul.f32 -1.442695, %v388_v6 }
 0x2d0   :  { %v515_v10 = vmul.f32 -1.442695, %v383_v8 }
 0x2d1   :  { %683 = vpow2.f32 %v516_v9 }
 0x2d2   :  { %685 = vpow2.f32 %v515_v10 }
 0x2db   :  { %v684_v11 = vpop.eup %683 }
 0x2dc   :  { %v686_v12 = vpop.eup %685  ;;  %v398_v13 = vadd.f32 1.0, %v684_v11 }
 0x2dd   :  { %v397_v14 = vadd.f32 1.0, %v686_v12 }
 0x2de   :  { %687 = vrcp.f32 %v398_v13 }
 0x2df   :  { %689 = vrcp.f32 %v397_v14 }
 0x2e8   :  { %v688_v15 = vpop.eup %687 }
 0x2e9   :  { %v690_v16 = vpop.eup %689  ;;  %v404_v18 = vmul.f32 %v688_v15, %v388_v6 }
 0x2ea   :  { %v403_v17 = vmul.f32 %v690_v16, %v383_v8 }
 0x2ec   :  { %595 = vmatprep.mubr.msk.f32.mxu0 %vm414_vm2, %v403_v17 }
 0x2ed   :  { %596 = vmatmul.mubr.msk.f32.vlgmr.msra.gmra.mrb[6].mxu0 %vm414_vm2, %v404_v18 }
 0x3c0   :  { %v597_v20 = vpop.f32.mrb[6].mxu0 }
 0x3c1   :  { %v493_v21 = vadd.f32 %v597_v20, %v517_v19  ;;  %v487_v22 = vpop.f32.mrb[7].mxu0 }
 0x3c2   :  { %v488_v23 = vadd.f32 %v517_v19, %v487_v22 }
 0x3c3   :  { %498 = vst.msk [vmem:[%s925_s9 + $0x8] sm:$0xff] %vm496_vm3, %v493_v21 }
 0x3c4   :  { %497 = vst.msk [vmem:[%s925_s9] sm:$0xff] %vm496_vm3, %v488_v23 }

</bundles_post_ra>
